<compile_context>
chip_gen: v7x
topology: tpu7x:2x2x1
jax: 0.10.0
libtpu: 0.0.40
codegen_flags: <defaults>
</compile_context>

<pallas_src>
import functools

import jax
import jax.numpy as jnp
from jax.experimental import pallas as pl
from jax.experimental.pallas import tpu as pltpu


def _dice_kernel(remap_ref, x_ref, t_ref, o_ref, acc_ref, *, smooth, ignore_index):
    # remap_ref: (2,) i32 SMEM  -> [do_replace, replacement_value]
    # x_ref:     (1, C, TH, W)  logits tile (native dtype)
    # t_ref:     (1, TH, W)     i32 labels tile
    # o_ref:     (1, 1) f32 SMEM output (loss)
    # acc_ref:   (3,)  f32 SMEM scratch: [intersection, sum_p, sum_t]
    b = pl.program_id(0)
    h = pl.program_id(1)
    is_first = jnp.logical_and(b == 0, h == 0)
    is_last = jnp.logical_and(b == pl.num_programs(0) - 1,
                              h == pl.num_programs(1) - 1)

    @pl.when(is_first)
    def _():
        acc_ref[0] = 0.0
        acc_ref[1] = 0.0
        acc_ref[2] = 0.0

    x = x_ref[0].astype(jnp.float32)          # (C, TH, W) — upcast in-kernel
    t = t_ref[0]                              # (TH, W) int32

    # ignore_index remap: global decision made in the wrapper, applied per tile.
    do_replace = remap_ref[0] > 0
    t = jnp.where(jnp.logical_and(do_replace, t == ignore_index), remap_ref[1], t)

    # channel softmax pieces; channel axis is the leading (non-minor) axis,
    # so max/sum are plain VPU reductions across C vregs.
    m = jnp.max(x, axis=0, keepdims=True)          # (1, TH, W)
    e = jnp.exp(x - m)                             # (C, TH, W)
    denom = jnp.sum(e, axis=0, keepdims=True)      # (1, TH, W)
    recip = 1.0 / denom                            # exact; only a (1, TH, W) divide

    # one-hot(label) over channels via iota compare (scatter_ equivalent).
    ch = jax.lax.broadcasted_iota(jnp.int32, x.shape, 0)
    onehot = (ch == t[None]).astype(jnp.float32)   # (C, TH, W)

    sel = jnp.sum(onehot * e, axis=0, keepdims=True)   # e[label] per pixel (0 if OOR)
    inter = jnp.sum(sel * recip)                       # sum(p * onehot) for this tile
    sum_p = jnp.sum(denom * recip)                     # == sum(softmax) for this tile
    sum_t = jnp.sum(onehot)                            # guards out-of-range labels

    acc_ref[0] += inter
    acc_ref[1] += sum_p
    acc_ref[2] += sum_t

    @pl.when(is_last)
    def _():
        loss = 1.0 - (2.0 * acc_ref[0] + smooth) / (acc_ref[1] + acc_ref[2] + smooth)
        o_ref[0, 0] = loss


def _pick_tile_h(H, W, C, itemsize, budget_bytes=4 << 20):
    """Largest row-tile TH dividing H, multiple of 8 (or == H), fitting the budget."""
    cands = [th for th in range(1, H + 1)
             if H % th == 0 and (th % 8 == 0 or th == H)]
    fit = [th for th in cands if C * th * W * itemsize <= budget_bytes]
    return max(fit) if fit else min(cands)


def dice_loss(output, target, *, smooth=1.0, ignore_index=255):
    """output: (B, C, H, W) float logits;  target: (B, H, W) integer labels."""
    B, C, H, W = output.shape
    target = target.astype(jnp.int32)

    # --- ignore_index handling (matches the PyTorch data-dependent branch) ---
    # `ignore_index in range(min, max)`  <=>  min <= ignore_index < max
    tmin = jnp.min(target)
    tmax = jnp.max(target)
    in_range = jnp.logical_and(ignore_index >= tmin, ignore_index < tmax)
    has_ignore = jnp.any(target == ignore_index)
    do_replace = jnp.logical_and(jnp.logical_not(in_range), has_ignore)
    remap = jnp.stack([do_replace.astype(jnp.int32), tmin]).astype(jnp.int32)

    th = _pick_tile_h(H, W, C, jnp.dtype(output.dtype).itemsize)
    grid = (B, H // th)

    loss = pl.pallas_call(
        functools.partial(_dice_kernel, smooth=float(smooth),
                          ignore_index=int(ignore_index)),
        out_shape=jax.ShapeDtypeStruct((1, 1), jnp.float32),
        grid=grid,
        in_specs=[
            # ignore_index remap scalars (resident in SMEM)
            pl.BlockSpec((2,), lambda b, h: (0,), memory_space=pltpu.SMEM),
            # NCHW logits: no wrapper transpose, tile over batch and H rows
            pl.BlockSpec((1, C, th, W), lambda b, h: (b, 0, h, 0)),
            # labels: matching (1, TH, W) tile
            pl.BlockSpec((1, th, W), lambda b, h: (b, h, 0)),
        ],
        out_specs=pl.BlockSpec((1, 1), lambda b, h: (0, 0),
                               memory_space=pltpu.SMEM),
        scratch_shapes=[pltpu.SMEM((3,), jnp.float32)],
        compiler_params=pltpu.CompilerParams(
            # both grid axes feed the serial SMEM accumulator -> "arbitrary"
            # TODO(synk): per-core partial sums would let the batch axis go
            # "parallel" across v7x's two TensorCores.
            dimension_semantics=("arbitrary", "arbitrary"),
            vmem_limit_bytes=32 * 1024 * 1024,
        ),
    )(remap, output, target)
    return loss[0, 0]


def _dice_loss_ref(output, target, *, smooth=1.0, ignore_index=255):
    # pure-JAX reference mirroring the PyTorch forward
    target = target.astype(jnp.int32)
    tmin, tmax = jnp.min(target), jnp.max(target)
    in_range = (ignore_index >= tmin) & (ignore_index < tmax)
    has_ignore = jnp.any(target == ignore_index)
    do_replace = (~in_range) & has_ignore
    target = jnp.where(do_replace & (target == ignore_index), tmin, target)
    C = output.shape[1]
    onehot = jax.nn.one_hot(target, C, axis=1, dtype=jnp.float32)   # (B, C, H, W)
    p = jax.nn.softmax(output.astype(jnp.float32), axis=1)
    inter = jnp.sum(p * onehot)
    return 1.0 - (2.0 * inter + smooth) / (jnp.sum(p) + jnp.sum(onehot) + smooth)


if __name__ == "__main__":
    key = jax.random.PRNGKey(0)
    k1, k2, k3 = jax.random.split(key, 3)

    B, C, H, W = 2, 4, 16, 16
    logits = jax.random.normal(k1, (B, C, H, W), dtype=jnp.float32)
    labels = jax.random.randint(k2, (B, H, W), 0, C, dtype=jnp.int32)

    # case 1: plain labels, f32 logits
    loss = jax.block_until_ready(dice_loss(logits, labels))
    ref = _dice_loss_ref(logits, labels)
    assert jnp.allclose(loss, ref, atol=1e-5, rtol=1e-5), (loss, ref)

    # case 2: labels containing ignore_index (exercises the in-kernel remap)
    mask = jax.random.bernoulli(k3, 0.1, (B, H, W))
    labels_ig = jnp.where(mask, 255, labels).astype(jnp.int32)
    loss_ig = jax.block_until_ready(dice_loss(logits, labels_ig))
    ref_ig = _dice_loss_ref(logits, labels_ig)
    assert jnp.allclose(loss_ig, ref_ig, atol=1e-5, rtol=1e-5), (loss_ig, ref_ig)

    # case 3: bf16 logits DMA'd natively (upcast happens inside the kernel)
    logits_bf16 = logits.astype(jnp.bfloat16)
    loss_bf = jax.block_until_ready(dice_loss(logits_bf16, labels))
    ref_bf = _dice_loss_ref(logits_bf16, labels)
    assert jnp.allclose(loss_bf, ref_bf, atol=1e-5, rtol=1e-5), (loss_bf, ref_bf)

    print("KERNEL_OK")
</pallas_src>

<mosaic_0001>
module attributes {stable_mosaic.version = 11 : i64} {
  func.func @_dice_kernel(%arg0: i32, %arg1: i32, %arg2: memref<2xi32, #tpu.memory_space<smem>>, %arg3: memref<1x4x16x16xf32, #tpu.memory_space<vmem>>, %arg4: memref<1x16x16xi32, #tpu.memory_space<vmem>>, %arg5: memref<1x1xf32, #tpu.memory_space<smem>>, %arg6: memref<3xf32, #tpu.memory_space<smem>>) attributes {dimension_semantics = [#tpu.dimension_semantics<arbitrary>, #tpu.dimension_semantics<arbitrary>], iteration_bounds = array<i64: 2, 1>, scalar_prefetch = 0 : i64, scratch_operands = 1 : i64, tpu.core_type = #tpu.core_type<tc>, window_params = [{transform_indices = @transform_0, window_bounds = array<i64: 2>}, {transform_indices = @transform_1, window_bounds = array<i64: 1, 4, 16, 16>}, {transform_indices = @transform_2, window_bounds = array<i64: 1, 16, 16>}, {transform_indices = @transform_3, window_bounds = array<i64: 1, 1>}]} {
    %c0_i32 = arith.constant 0 : i32
    %0 = arith.cmpi eq, %arg0, %c0_i32 : i32
    %c0_i32_0 = arith.constant 0 : i32
    %1 = arith.cmpi eq, %arg1, %c0_i32_0 : i32
    %2 = arith.andi %0, %1 : i1
    %c1_i32 = arith.constant 1 : i32
    %3 = arith.cmpi eq, %arg0, %c1_i32 : i32
    %c0_i32_1 = arith.constant 0 : i32
    %4 = arith.cmpi eq, %arg1, %c0_i32_1 : i32
    %5 = arith.andi %3, %4 : i1
    %6 = arith.extui %2 : i1 to i32
    %c0_i32_2 = arith.constant 0 : i32
    %7 = arith.cmpi ne, %6, %c0_i32_2 : i32
    scf.if %7 {
      %cst_23 = arith.constant 0.000000e+00 : f32
      %c0_24 = arith.constant 0 : index
      %64 = memref.load %arg6[%c0_24] : memref<3xf32, #tpu.memory_space<smem>>
      memref.store %cst_23, %arg6[%c0_24] : memref<3xf32, #tpu.memory_space<smem>>
      %cst_25 = arith.constant 0.000000e+00 : f32
      %c1_26 = arith.constant 1 : index
      %65 = memref.load %arg6[%c1_26] : memref<3xf32, #tpu.memory_space<smem>>
      memref.store %cst_25, %arg6[%c1_26] : memref<3xf32, #tpu.memory_space<smem>>
      %cst_27 = arith.constant 0.000000e+00 : f32
      %c2_28 = arith.constant 2 : index
      %66 = memref.load %arg6[%c2_28] : memref<3xf32, #tpu.memory_space<smem>>
      memref.store %cst_27, %arg6[%c2_28] : memref<3xf32, #tpu.memory_space<smem>>
    } else {
    }
    %c0 = arith.constant 0 : index
    %c0_3 = arith.constant 0 : index
    %c0_4 = arith.constant 0 : index
    %c0_5 = arith.constant 0 : index
    %8 = vector.load %arg3[%c0, %c0_3, %c0_4, %c0_5] : memref<1x4x16x16xf32, #tpu.memory_space<vmem>>, vector<1x4x16x16xf32>
    %9 = vector.shape_cast %8 : vector<1x4x16x16xf32> to vector<4x16x16xf32>
    %c0_6 = arith.constant 0 : index
    %c0_7 = arith.constant 0 : index
    %c0_8 = arith.constant 0 : index
    %10 = vector.load %arg4[%c0_6, %c0_7, %c0_8] : memref<1x16x16xi32, #tpu.memory_space<vmem>>, vector<1x16x16xi32>
    %11 = vector.shape_cast %10 : vector<1x16x16xi32> to vector<16x16xi32>
    %c0_9 = arith.constant 0 : index
    %12 = memref.load %arg2[%c0_9] : memref<2xi32, #tpu.memory_space<smem>>
    %c0_i32_10 = arith.constant 0 : i32
    %13 = arith.cmpi sgt, %12, %c0_i32_10 : i32
    %c255_i32 = arith.constant 255 : i32
    %14 = vector.broadcast %c255_i32 : i32 to vector<16x16xi32>
    %15 = arith.cmpi eq, %11, %14 : vector<16x16xi32>
    %16 = vector.broadcast %13 : i1 to vector<16x16xi1>
    %17 = arith.andi %16, %15 : vector<16x16xi1>
    %c1 = arith.constant 1 : index
    %18 = memref.load %arg2[%c1] : memref<2xi32, #tpu.memory_space<smem>>
    %19 = vector.broadcast %18 : i32 to vector<16x16xi32>
    %20 = arith.select %17, %19, %11 : vector<16x16xi1>, vector<16x16xi32>
    %cst = arith.constant dense<0xFF800000> : vector<16x16xf32>
    %21 = vector.multi_reduction <maximumf>, %9, %cst [0] : vector<4x16x16xf32> to vector<16x16xf32>
    %22 = vector.shape_cast %21 : vector<16x16xf32> to vector<1x16x16xf32>
    %23 = vector.broadcast %22 : vector<1x16x16xf32> to vector<4x16x16xf32>
    %24 = arith.subf %9, %23 : vector<4x16x16xf32>
    %25 = math.exp %24 : vector<4x16x16xf32>
    %cst_11 = arith.constant dense<0.000000e+00> : vector<16x16xf32>
    %26 = vector.multi_reduction <add>, %25, %cst_11 [0] : vector<4x16x16xf32> to vector<16x16xf32>
    %27 = vector.shape_cast %26 : vector<16x16xf32> to vector<1x16x16xf32>
    %cst_12 = arith.constant 1.000000e+00 : f32
    %28 = vector.broadcast %cst_12 : f32 to vector<1x16x16xf32>
    %29 = arith.divf %28, %27 : vector<1x16x16xf32>
    %30 = tpu.iota {dimensions = array<i32: 0>} : vector<4x16x16xi32>
    %31 = vector.shape_cast %20 : vector<16x16xi32> to vector<1x16x16xi32>
    %32 = vector.broadcast %31 : vector<1x16x16xi32> to vector<4x16x16xi32>
    %33 = arith.cmpi eq, %30, %32 : vector<4x16x16xi32>
    %34 = arith.extui %33 : vector<4x16x16xi1> to vector<4x16x16xi32>
    %35 = arith.sitofp %34 : vector<4x16x16xi32> to vector<4x16x16xf32>
    %36 = arith.mulf %35, %25 : vector<4x16x16xf32>
    %cst_13 = arith.constant dense<0.000000e+00> : vector<16x16xf32>
    %37 = vector.multi_reduction <add>, %36, %cst_13 [0] : vector<4x16x16xf32> to vector<16x16xf32>
    %38 = vector.shape_cast %37 : vector<16x16xf32> to vector<1x16x16xf32>
    %39 = arith.mulf %38, %29 : vector<1x16x16xf32>
    %40 = vector.shape_cast %39 : vector<1x16x16xf32> to vector<1x1x16x16xf32>
    %cst_14 = arith.constant dense<0.000000e+00> : vector<1xf32>
    %41 = vector.multi_reduction <add>, %40, %cst_14 [1, 2, 3] : vector<1x1x16x16xf32> to vector<1xf32>
    %42 = vector.shape_cast %41 : vector<1xf32> to vector<1x1x1x1xf32>
    %43 = vector.extract %42[0, 0, 0, 0] : f32 from vector<1x1x1x1xf32>
    %44 = arith.mulf %27, %29 : vector<1x16x16xf32>
    %45 = vector.shape_cast %44 : vector<1x16x16xf32> to vector<1x1x16x16xf32>
    %cst_15 = arith.constant dense<0.000000e+00> : vector<1xf32>
    %46 = vector.multi_reduction <add>, %45, %cst_15 [1, 2, 3] : vector<1x1x16x16xf32> to vector<1xf32>
    %47 = vector.shape_cast %46 : vector<1xf32> to vector<1x1x1x1xf32>
    %48 = vector.extract %47[0, 0, 0, 0] : f32 from vector<1x1x1x1xf32>
    %49 = vector.shape_cast %35 : vector<4x16x16xf32> to vector<1x4x16x16xf32>
    %cst_16 = arith.constant dense<0.000000e+00> : vector<1xf32>
    %50 = vector.multi_reduction <add>, %49, %cst_16 [1, 2, 3] : vector<1x4x16x16xf32> to vector<1xf32>
    %51 = vector.shape_cast %50 : vector<1xf32> to vector<1x1x1x1xf32>
    %52 = vector.extract %51[0, 0, 0, 0] : f32 from vector<1x1x1x1xf32>
    %c0_17 = arith.constant 0 : index
    %53 = memref.load %arg6[%c0_17] : memref<3xf32, #tpu.memory_space<smem>>
    %54 = arith.addf %53, %43 : f32
    %c0_18 = arith.constant 0 : index
    %55 = memref.load %arg6[%c0_18] : memref<3xf32, #tpu.memory_space<smem>>
    memref.store %54, %arg6[%c0_18] : memref<3xf32, #tpu.memory_space<smem>>
    %c1_19 = arith.constant 1 : index
    %56 = memref.load %arg6[%c1_19] : memref<3xf32, #tpu.memory_space<smem>>
    %57 = arith.addf %56, %48 : f32
    %c1_20 = arith.constant 1 : index
    %58 = memref.load %arg6[%c1_20] : memref<3xf32, #tpu.memory_space<smem>>
    memref.store %57, %arg6[%c1_20] : memref<3xf32, #tpu.memory_space<smem>>
    %c2 = arith.constant 2 : index
    %59 = memref.load %arg6[%c2] : memref<3xf32, #tpu.memory_space<smem>>
    %60 = arith.addf %59, %52 : f32
    %c2_21 = arith.constant 2 : index
    %61 = memref.load %arg6[%c2_21] : memref<3xf32, #tpu.memory_space<smem>>
    memref.store %60, %arg6[%c2_21] : memref<3xf32, #tpu.memory_space<smem>>
    %62 = arith.extui %5 : i1 to i32
    %c0_i32_22 = arith.constant 0 : i32
    %63 = arith.cmpi ne, %62, %c0_i32_22 : i32
    scf.if %63 {
      %c0_23 = arith.constant 0 : index
      %64 = memref.load %arg6[%c0_23] : memref<3xf32, #tpu.memory_space<smem>>
      %cst_24 = arith.constant 2.000000e+00 : f32
      %65 = arith.mulf %cst_24, %64 : f32
      %cst_25 = arith.constant 1.000000e+00 : f32
      %66 = arith.addf %65, %cst_25 : f32
      %c1_26 = arith.constant 1 : index
      %67 = memref.load %arg6[%c1_26] : memref<3xf32, #tpu.memory_space<smem>>
      %c2_27 = arith.constant 2 : index
      %68 = memref.load %arg6[%c2_27] : memref<3xf32, #tpu.memory_space<smem>>
      %69 = arith.addf %67, %68 : f32
      %cst_28 = arith.constant 1.000000e+00 : f32
      %70 = arith.addf %69, %cst_28 : f32
      %71 = arith.divf %66, %70 : f32
      %cst_29 = arith.constant 1.000000e+00 : f32
      %72 = arith.subf %cst_29, %71 : f32
      %c0_30 = arith.constant 0 : index
      %c0_31 = arith.constant 0 : index
      %73 = memref.load %arg5[%c0_30, %c0_31] : memref<1x1xf32, #tpu.memory_space<smem>>
      memref.store %72, %arg5[%c0_30, %c0_31] : memref<1x1xf32, #tpu.memory_space<smem>>
    } else {
    }
    return
  }
  func.func @transform_0(%arg0: i32, %arg1: i32) -> i32 {
    %c0_i32 = arith.constant 0 : i32
    %c0_i32_0 = arith.constant 0 : i32
    return %c0_i32 : i32
  }
  func.func @transform_1(%arg0: i32, %arg1: i32) -> (i32, i32, i32, i32) {
    %c0_i32 = arith.constant 0 : i32
    %c0_i32_0 = arith.constant 0 : i32
    %c0_i32_1 = arith.constant 0 : i32
    return %arg0, %c0_i32, %arg1, %c0_i32_0 : i32, i32, i32, i32
  }
  func.func @transform_2(%arg0: i32, %arg1: i32) -> (i32, i32, i32) {
    %c0_i32 = arith.constant 0 : i32
    %c0_i32_0 = arith.constant 0 : i32
    return %arg0, %arg1, %c0_i32 : i32, i32, i32
  }
  func.func @transform_3(%arg0: i32, %arg1: i32) -> (i32, i32) {
    %c0_i32 = arith.constant 0 : i32
    %c0_i32_0 = arith.constant 0 : i32
    %c0_i32_1 = arith.constant 0 : i32
    return %c0_i32, %c0_i32_0 : i32, i32
  }
}

</mosaic_0001>

<bundles_post_ra>
// kernel: tpu_custom_call.1
= control target key start
LH: loop header
LB: loop body
LE: loop exit
PB: predicated region body
PF: predicated region fallthrough
CT: control target
= control target key end

     0   :  { %8 = vsyncpa [#allocation5], 0  ;;  %s1173_s0 = inlined_call_operand.hbm [shape: s32[2], index: 0, kind: input, shape index: {}]   ;;  %s1174_s1 = inlined_call_operand.hbm [shape: f32[2,4,16,16], index: 1, kind: input, shape index: {}]   ;;  %s1175_s2 = inlined_call_operand.hbm [shape: s32[2,16,16], index: 2, kind: input, shape index: {}]   ;;  %s1176_s3 = inlined_call_operand.hbm [shape: f32[1,1], index: 3, kind: output, shape index: {}]  }
   0x1   :  { %9 = vsyncpa [#allocation4], 0 }
   0x2   :  { %11 = vsyncpa [#allocation4 + $0x1], 0 }
   0x3   :  { %12 = vsyncpa [#allocation9], 0 }
   0x4   :  { %14 = vsyncpa [#allocation9 + $0x1], 0 }
   0x5   :  { %15 = vsyncpa [#allocation6], 0  ;;  %s907_s12 = smov 0   ;;  %s909_s13 = smov 0  }
   0x6   :  { %s911_s14 = smov 0   ;;  %s913_s15 = smov 0  }
   0x7   :  { %s915_s16 = smov 0   ;;  %s917_s17 = smov 0  }
   0x8 LB: > { %s578_s18 = sadd.s32 4294967295, %s877_s17   ;;  %s63_s19 = sadd.s32 1, %s865_s14  ;;  %s877_s17 = sphi %s917_s17, %s21_s17   ;;  %s873_s16 = sphi %s915_s16, %s1190_s16   ;;  %s869_s15 = sphi %s913_s15, %s1189_s15   ;;  %s865_s14 = sphi %s911_s14, %s1188_s14   ;;  %s861_s13 = sphi %s909_s13, %s1187_s13   ;;  %s857_s12 = sphi %s907_s12, %s1186_s12  }
   0x9   : > { %p70_p0 = scmp.ne.s32.totalorder %s865_s14, %s861_s13  ;;  %p71_p1 = scmp.eq.s32.totalorder %s877_s17, 0 }
   0xa   : > { %p76_p2 = scmp.ne.s32.totalorder %s861_s13, %s857_s12  ;;  %p943_p3 = scmp.eq.s32.totalorder %s578_s18, 0 }
   0xb   : > { %p72_p4 = por %p71_p1, %p70_p0  ;;  %p579_p5 = scmp.ge.s32.totalorder %s877_s17, 1 }
   0xc   : > { %s1180_s20 = scalar_select %p943_p3, 1, 0 }
   0xd   : > { %p950_p6 = por %p943_p3, %p76_p2  ;;  %p136_p7 = scmp.lt.s32.totalorder %s877_s17, 3 }
   0xe   : > { %p650_p9 = scmp.lt.s32.totalorder %s877_s17, 2  ;;  %s33_s24 = sadd.s32 1, %s873_s16 }
   0xf   : > { %s1181_s21 = scalar_select %p950_p6, 1, 0 }
  0x10   : > { %p955_p8 = pnand %p579_p5, %p136_p7  ;;  %p962_p11 = pnand %p650_p9, %p72_p4 }
  0x11   : > { %p35_p13 = scmp.ge.s32.totalorder %s33_s24, 2  ;;  %s970_s25 = sand.u32 1, %s865_s14  }
  0x12   : > { %p638_p10 = pneg %p955_p8  ;;  %s730_s28 = scalar_lea.hbm %s1173_s0, 16 }
  0x13   : > { %p731_p0 = scmp.ne.s32.totalorder %s1173_s0, %s730_s28  ;;  %p737_p5 = scmp.lt.u32.totalorder %s730_s28, %s1173_s0 }
  0x14   : > { %p639_p12 = pnand %p638_p10, %p943_p3 }
  0x16   : > { %p732_p1 = pneg %p639_p12 }
  0x18   : > { %p733_p2 = pnand %p732_p1, %p731_p0 }
  0x1a   : > { %p734_p4 = pneg %p733_p2 }
  0x1c   : > { %p739_p7 = pnand %p737_p5, %p734_p4 }
  0x1e   : > { %742 = shalt.err (!%p739_p7)
}
  0x1f   : > { %s879_s6 = smov [#allocation3]   ;;  %s1192_s24 = smov (%p35_p13, %s33_s24), 0 }
  0x20   : > { %641 = dma.hbm_to_smem (!%p639_p12), %s1173_s0, 16, %s879_s6, [#allocation5]  }
  0x21   : > { %s582_s9 = sshll.u32 %s970_s25, 6  ;;  %s611_s10 = sshll.u32 %s873_s16, 10 }
  0x22   : > { %s58_s11 = ssub.s32 %s873_s16, %s1192_s24  ;;  %s993_s27 = scalar_lea.hbm %s1174_s1, %s611_s10 }
  0x23   : > { %p61_p9 = scmp.eq.s32.totalorder %s58_s11, 0  ;;  %s162_s28 = scalar_lea.vmem [#allocation7], %s582_s9 }
  0x24   : > { %s171_s29 = sshll.u32 %s162_s28, 4  ;;  %s159_s4 = scalar_lea.sflag [#allocation4], %s970_s25  ;;  %s1000_s29 = int_to_ptr.vmem [resolvable:$true] %s171_s29 }
  0x25   : > { %s998_s30 = scalar_select %p61_p9, %s865_s14, %s63_s19  }
  0x26   : > { %s743_s5 = scalar_lea.hbm %s993_s27, 1024  ;;  %p745_p12 = pneg %p962_p11 }
  0x27   : > { %p744_p10 = scmp.ne.s32.totalorder %s993_s27, %s743_s5  ;;  %s748_s8 = scalar_lea.hbm %s1174_s1, 2048 }
  0x28   : > { %p749_p1 = scmp.lt.u32.totalorder %s993_s27, %s1174_s1  ;;  %p750_p2 = scmp.lt.u32.totalorder %s748_s8, %s743_s5 }
  0x29   : > { %p746_p13 = pnand %p745_p12, %p744_p10  ;;  %p752_p5 = scmp.lt.u32.totalorder %s743_s5, %s993_s27 }
  0x2a   : > { %p751_p4 = por %p750_p2, %p749_p1 }
  0x2b   : > { %p747_p0 = pneg %p746_p13 }
  0x2c   : > { %p753_p7 = por %p752_p5, %p751_p4 }
  0x2e   : > { %p754_p9 = pnand %p753_p7, %p747_p0 }
  0x30   : > { %757 = shalt.err (!%p754_p9)
}
  0x31   : > { %s758_s19 = scalar_lea.vmem %s1000_s29, 1024  ;;  %s880_s11 = smov [#allocation7]  }
  0x32   : > { %p759_p10 = scmp.ne.s32.totalorder %s1000_s29, %s758_s19  ;;  %s763_s12 = sshll.u32 %s880_s11, 4  ;;  %s764_s12 = int_to_ptr.vmem [resolvable:$false] %s763_s12 }
  0x33   : > { %s765_s26 = scalar_lea.vmem %s764_s12, 2048  ;;  %p766_p3 = scmp.lt.s32.totalorder %s1000_s29, %s764_s12 }
  0x34   : > { %p761_p13 = pnand %p759_p10, %p745_p12  ;;  %p767_p1 = scmp.lt.s32.totalorder %s765_s26, %s758_s19 }
  0x36   : > { %p762_p6 = pneg %p761_p13  ;;  %p768_p2 = por %p767_p1, %p766_p3 }
  0x38   : > { %p769_p4 = pnand %p768_p2, %p762_p6 }
  0x3a   : > { %772 = shalt.err (!%p769_p4)
}
  0x3b   : > { %s881_s28 = smov 128   ;;  %s882_s5 = smov 8  }
  0x3c   : > { %645 = dma.hbm_to_vmem [thread:$0]  (!%p962_p11), %s993_s27, 1024, %s1000_s29, %s159_s4, %s881_s28, %s881_s28, %s882_s5  }
  0x3d   : > { %s585_s6 = sshll.u32 %s970_s25, 4  ;;  %s612_s7 = sshll.u32 %s873_s16, 8 }
  0x3e   : > { %s1038_s10 = scalar_lea.hbm %s1175_s2, %s612_s7  ;;  %s185_s19 = scalar_lea.vmem [#allocation8], %s585_s6 }
  0x3f   : > { %s194_s11 = sshll.u32 %s185_s19, 4  ;;  %s182_s12 = scalar_lea.sflag [#allocation9], %s970_s25  ;;  %s1040_s11 = int_to_ptr.vmem [resolvable:$true] %s194_s11 }
  0x40   : > { %s773_s26 = scalar_lea.hbm %s1038_s10, 256  ;;  %s778_s4 = scalar_lea.hbm %s1175_s2, 512 }
  0x41   : > { %p774_p3 = scmp.ne.s32.totalorder %s1038_s10, %s773_s26  ;;  %p779_p5 = scmp.lt.u32.totalorder %s1038_s10, %s1175_s2 }
  0x42   : > { %p780_p7 = scmp.lt.u32.totalorder %s778_s4, %s773_s26  ;;  %p782_p10 = scmp.lt.u32.totalorder %s773_s26, %s1038_s10 }
  0x43   : > { %p776_p6 = pnand %p774_p3, %p745_p12 }
  0x44   : > { %p781_p9 = por %p780_p7, %p779_p5 }
  0x45   : > { %p777_p0 = pneg %p776_p6 }
  0x46   : > { %p783_p13 = por %p782_p10, %p781_p9 }
  0x48   : > { %p784_p1 = pnand %p783_p13, %p777_p0 }
  0x4a   : > { %787 = shalt.err (!%p784_p1)
}
  0x4b   : > { %s788_s6 = scalar_lea.vmem %s1040_s11, 256  ;;  %s883_s9 = smov [#allocation8]  }
  0x4c   : > { %p789_p2 = scmp.ne.s32.totalorder %s1040_s11, %s788_s6  ;;  %s793_s19 = sshll.u32 %s883_s9, 4  ;;  %s794_s19 = int_to_ptr.vmem [resolvable:$false] %s793_s19 }
  0x4d   : > { %s795_s27 = scalar_lea.vmem %s794_s19, 512  ;;  %p796_p6 = scmp.lt.s32.totalorder %s1040_s11, %s794_s19 }
  0x4e   : > { %p791_p4 = pnand %p789_p2, %p745_p12  ;;  %p797_p5 = scmp.lt.s32.totalorder %s795_s27, %s788_s6 }
  0x50   : > { %p792_p3 = pneg %p791_p4  ;;  %p798_p7 = por %p797_p5, %p796_p6 }
  0x52   : > { %p799_p9 = pnand %p798_p7, %p792_p3 }
  0x54   : > { %802 = shalt.err (!%p799_p9)
}
  0x55   : > { %648 = dma.hbm_to_vmem [thread:$0]  (!%p962_p11), %s1038_s10, 256, %s1040_s11, %s182_s12, %s881_s28, %s881_s28, %s882_s5  }
  0x56   : > { %206 = sbr.rel (%p955_p8) target bundleno = 464 (0x1d0), region = 32  ;;  %p1184_p12 = scmp.ne.s32.totalorder (!%p955_p8), %s1180_s20, 0 }
  0x5d   : > { %840 = dma.done.wait (%p1184_p12), [#allocation5], 16  }
  0x5e   : > { %842 = vsyncadd (%p1184_p12), [#allocation5], 4294967280  ;;  %s212_s23 = sand.u32 1, %s861_s13   ;;  %p1185_p0 = scmp.ne.s32.totalorder %s1181_s21, 0 }
  0x5f   : > { %s590_s26 = sshll.u32 %s212_s23, 6  ;;  %s213_s29 = scalar_lea.sflag [#allocation4], %s212_s23 }
  0x60   : > { %s216_s4 = scalar_lea.vmem [#allocation7], %s590_s26 }
  0x61   : > { %844 = dma.done.wait (%p1185_p0), %s213_s29, 1024  }
  0x62   : > { %846 = vsyncadd (%p1185_p0), %s213_s29, 4294966272  ;;  %s591_s22 = sshll.u32 %s212_s23, 4  ;;  %s222_s25 = scalar_lea.sflag [#allocation9], %s212_s23 }
  0x63   : > { %s225_s28 = scalar_lea.vmem [#allocation8], %s591_s22 }
  0x64   : > { %848 = dma.done.wait (%p1185_p0), %s222_s25, 256  }
  0x65   : > { %850 = vsyncadd (%p1185_p0), %s222_s25, 4294967040 }
  0x66   : > { %230 = sfence }
  0x67   : > { %s276_s20 = sld [smem:[#allocation3]]  ;;  %s1086_s5 = sld [smem:[#allocation3 + $0x1]]  ;;  %vm289_vm0 = vcmask 130048   ;;  %v1088_v0 = vld [vmem:[%s216_s4] sm:$0xff]  ;;  %v1090_v1 = vld [vmem:[%s216_s4 + $0x8] sm:$0xff]  ;;  %v1092_v2 = vld [vmem:[%s216_s4 + $0x10] sm:$0xff] }
  0x68   : > { %v269_v3 = vld [vmem:[%s216_s4 + $0x18] sm:$0xff]  ;;  %v270_v4 = vld [vmem:[%s216_s4 + $0x20] sm:$0xff]  ;;  %v290_v5 = vsel %vm289_vm0, %v1088_v0, -inf  ;;  %v297_v6 = vsel %vm289_vm0, %v1090_v1, -inf  ;;  %v271_v7 = vld [vmem:[%s216_s4 + $0x28] sm:$0xff]  ;;  %v291_v10 = vsel %vm289_vm0, %v1092_v2, -inf }
  0x69   : > { %v272_v8 = vld [vmem:[%s216_s4 + $0x30] sm:$0xff]  ;;  %v273_v9 = vld [vmem:[%s216_s4 + $0x38] sm:$0xff]  ;;  %v292_v11 = vsel %vm289_vm0, %v270_v4, -inf  ;;  %v298_v12 = vsel %vm289_vm0, %v269_v3, -inf  ;;  %v299_v14 = vsel %vm289_vm0, %v271_v7, -inf  ;;  %v884_v36 = vmov 0.0  }
  0x6a   : > { %v294_v13 = vsel %vm289_vm0, %v272_v8, -inf  ;;  %v301_v15 = vsel %vm289_vm0, %v273_v9, -inf  ;;  %v293_v16 = vmax.f32 %v290_v5, %v292_v11  ;;  %v300_v18 = vmax.f32 %v297_v6, %v299_v14  ;;  %v274_v20 = vld [vmem:[%s225_s28] sm:$0xff]  ;;  %v275_v21 = vld [vmem:[%s225_s28 + $0x8] sm:$0xff]  ;;  %p255_p11 = scmp.eq.s32.totalorder %s869_s15, 1  ;;  %p251_p10 = scmp.eq.s32.totalorder %s869_s15, 0 }
  0x6b   : > { %v295_v17 = vmax.f32 %v291_v10, %v294_v13  ;;  %v302_v19 = vmax.f32 %v298_v12, %v301_v15  ;;  %vm278_vm1 = vcmp.eq.s32.totalorder %v274_v20, 255  ;;  %vm279_vm2 = vcmp.eq.s32.totalorder %v275_v21, 255  ;;  %s885_s10 = smov 0.0  }
  0x6c   : > { %631 = sst [smem:[#allocation2]] (%p251_p10), %s885_s10 }
  0x6d   : > { %p277_p8 = scmp.gt.s32.totalorder %s276_s20, 0  ;;  %v303_v22 = vmax.f32 %v300_v18, %v302_v19  ;;  %v296_v23 = vmax.f32 %v293_v16, %v295_v17  ;;  %v286_v25 = vstv %s1086_s5  ;;  %632 = sst [smem:[#allocation2 + $0x1]] (%p251_p10), %s885_s10 }
  0x6e   : > { %633 = sst [smem:[#allocation2 + $0x2]] (%p251_p10), %s885_s10  ;;  %s444_s11 = sld [smem:[#allocation2]] }
  0x6f   : > { %s280_s21 = scalar_select %p277_p8, 1, 0  ;;  %v307_v26 = vsub.f32 %v269_v3, %v303_v22  ;;  %v308_v27 = vsub.f32 %v270_v4, %v296_v23  ;;  %v309_v29 = vsub.f32 %v271_v7, %v303_v22  ;;  %v310_v30 = vsub.f32 %v272_v8, %v296_v23 }
  0x70   : > { %v311_v31 = vsub.f32 %v273_v9, %v303_v22  ;;  %v304_v33 = vsub.f32 %v1088_v0, %v296_v23  ;;  %v306_v41 = vsub.f32 %v1092_v2, %v296_v23  ;;  %v305_v43 = vsub.f32 %v1090_v1, %v303_v22  ;;  %s603_s12 = sld [smem:[#allocation2 + $0x1]]  ;;  %s604_s7 = sld [smem:[#allocation2 + $0x2]] }
  0x71   : > { %v281_v24 = vstv %s280_s21  ;;  %v318_v34 = vmul.f32 1.442695, %v307_v26  ;;  %v320_v35 = vmul.f32 1.442695, %v308_v27  ;;  %v322_v42 = vmul.f32 1.442695, %v309_v29 }
  0x72   : > { %vm282_vm3 = vcmp.eq.s32.totalorder %v281_v24, 1  ;;  %v324_v47 = vmul.f32 1.442695, %v310_v30  ;;  %v326_v50 = vmul.f32 1.442695, %v311_v31 }
  0x73   : > { %vm283_vm4 = vmand %vm282_vm3, %vm278_vm1  ;;  %708 = vpow2.f32 %v318_v34  ;;  %v312_v52 = vmul.f32 1.442695, %v304_v33  ;;  %v314_v54 = vmul.f32 1.442695, %v305_v43  ;;  %v316_v56 = vmul.f32 1.442695, %v306_v41 }
  0x74   : > { %vm284_vm5 = vmand %vm282_vm3, %vm279_vm2  ;;  %v287_v28 = vsel %vm283_vm4, %v286_v25, %v274_v20  ;;  %710 = vpow2.f32 %v320_v35 }
  0x75   : > { %v288_v32 = vsel %vm284_vm5, %v286_v25, %v275_v21  ;;  %vm346_vm6 = vcmp.eq.s32.totalorder %v287_v28, 0  ;;  %vm348_vm7 = vcmp.eq.s32.totalorder %v287_v28, 1  ;;  %vm350_vm10 = vcmp.eq.s32.totalorder %v287_v28, 2 }
  0x76   : > { %vm347_vm8 = vcmp.eq.s32.totalorder %v288_v32, 0  ;;  %vm349_vm9 = vcmp.eq.s32.totalorder %v288_v32, 1  ;;  %v595_v37 = vsel %vm346_vm6, 1.0, %v884_v36  ;;  %v597_v39 = vsel %vm348_vm7, 1.0, %v884_v36 }
  0x77   : > { %v596_v38 = vsel %vm347_vm8, 1.0, %v884_v36  ;;  %v598_v40 = vsel %vm349_vm9, 1.0, %v884_v36  ;;  %v420_v44 = vsel %vm289_vm0, %v595_v37, 0.0  ;;  %v423_v46 = vsel %vm289_vm0, %v597_v39, 0.0 }
  0x78   : > { %v421_v45 = vsel %vm289_vm0, %v596_v38, 0.0  ;;  %v599_v48 = vsel %vm350_vm10, 1.0, %v884_v36  ;;  %vm351_vm11 = vcmp.eq.s32.totalorder %v288_v32, 2  ;;  %v425_v51 = vsel %vm289_vm0, %v598_v40, 0.0 }
  0x79   : > { %v422_v49 = vadd.f32 %v421_v45, %v420_v44  ;;  %712 = vpow2.f32 %v322_v42  ;;  %vm352_vm12 = vcmp.eq.s32.totalorder %v287_v28, 3  ;;  %v427_v55 = vsel %vm289_vm0, %v599_v48, 0.0 }
  0x7a   : > { %714 = vpow2.f32 %v324_v47  ;;  %v600_v57 = vsel %vm351_vm11, 1.0, %v884_v36  ;;  %vm353_vm13 = vcmp.eq.s32.totalorder %v288_v32, 3  ;;  %v601_v60 = vsel %vm352_vm12, 1.0, %v884_v36 }
  0x7b   : > { %v424_v53 = vadd.f32 %v423_v46, %v422_v49  ;;  %716 = vpow2.f32 %v326_v50  ;;  %v429_v59 = vsel %vm289_vm0, %v600_v57, 0.0  ;;  %v431_v62 = vsel %vm289_vm0, %v601_v60, 0.0 }
  0x7c   : > { %718 = vpow2.f32 %v312_v52  ;;  %v602_v63 = vsel %vm353_vm13, 1.0, %v884_v36 }
  0x7d   : > { %v426_v58 = vadd.f32 %v425_v51, %v424_v53  ;;  %720 = vpow2.f32 %v314_v54  ;;  %v433_v1 = vsel %vm289_vm0, %v602_v63, 0.0  ;;  %v709_v2 = vpop.eup %708 }
  0x7e   : > { %722 = vpow2.f32 %v316_v56  ;;  %v711_v4 = vpop.eup %710  ;;  %v373_v10 = vmul.f32 %v709_v2, %v598_v40  ;;  %v336_v11 = vsel %vm289_vm0, %v709_v2, 0.0 }
  0x7f   : > { %v428_v61 = vadd.f32 %v427_v55, %v426_v58  ;;  %v331_v20 = vsel %vm289_vm0, %v711_v4, 0.0  ;;  %v374_v30 = vmul.f32 %v711_v4, %v599_v48 }
  0x80   : > { %v386_v25 = vsel %vm289_vm0, %v373_v10, 0.0 }
  0x81   : > { %v430_v0 = vadd.f32 %v429_v59, %v428_v61  ;;  %v381_v41 = vsel %vm289_vm0, %v374_v30, 0.0 }
  0x83   : > { %v432_v3 = vadd.f32 %v431_v62, %v430_v0  ;;  %v713_v5 = vpop.eup %712 }
  0x84   : > { %v715_v7 = vpop.eup %714  ;;  %v338_v16 = vsel %vm289_vm0, %v713_v5, 0.0  ;;  %v375_v26 = vmul.f32 %v713_v5, %v600_v57 }
  0x85   : > { %v434_v6 = vadd.f32 %v433_v1, %v432_v3  ;;  %v717_v8 = vpop.eup %716  ;;  %v333_v27 = vsel %vm289_vm0, %v715_v7, 0.0  ;;  %v376_v40 = vmul.f32 %v715_v7, %v601_v60 }
  0x86   : > { %v719_v9 = vpop.eup %718  ;;  %v340_v24 = vsel %vm289_vm0, %v717_v8, 0.0 }
  0x87   : > { %435 = vadd.xlane.f32.xlu1 %v434_v6  ;;  %v721_v12 = vpop.eup %720  ;;  %v328_v13 = vsel %vm289_vm0, %v719_v9, 0.0  ;;  %v370_v17 = vmul.f32 %v719_v9, %v595_v37  ;;  %v377_v37 = vmul.f32 %v717_v8, %v602_v63  ;;  %v383_v45 = vsel %vm289_vm0, %v376_v40, 0.0 }
  0x88   : > { %v723_v14 = vpop.eup %722  ;;  %v335_v15 = vsel %vm289_vm0, %v721_v12, 0.0  ;;  %v371_v18 = vmul.f32 %v721_v12, %v596_v38 }
  0x89   : > { %v329_v19 = vsel %vm289_vm0, %v723_v14, 0.0  ;;  %v337_v21 = vadd.f32 %v336_v11, %v335_v15  ;;  %v372_v22 = vmul.f32 %v723_v14, %v597_v39  ;;  %v378_v32 = vsel %vm289_vm0, %v370_v17, 0.0 }
  0x8a   : > { %v330_v23 = vadd.f32 %v329_v19, %v328_v13  ;;  %v385_v29 = vsel %vm289_vm0, %v371_v18, 0.0  ;;  %v388_v39 = vsel %vm289_vm0, %v375_v26, 0.0  ;;  %v390_v43 = vsel %vm289_vm0, %v377_v37, 0.0 }
  0x8b   : > { %v339_v28 = vadd.f32 %v338_v16, %v337_v21  ;;  %v379_v33 = vsel %vm289_vm0, %v372_v22, 0.0  ;;  %v387_v36 = vadd.f32 %v386_v25, %v385_v29 }
  0x8c   : > { %v332_v31 = vadd.f32 %v331_v20, %v330_v23  ;;  %v380_v38 = vadd.f32 %v379_v33, %v378_v32 }
  0x8d   : > { %v341_v34 = vadd.f32 %v340_v24, %v339_v28  ;;  %v389_v42 = vadd.f32 %v388_v39, %v387_v36 }
  0x8e   : > { %v334_v35 = vadd.f32 %v333_v27, %v332_v31  ;;  %v382_v44 = vadd.f32 %v381_v41, %v380_v38 }
  0x8f   : > { %724 = vrcp.f32 %v341_v34  ;;  %v391_v46 = vadd.f32 %v390_v43, %v389_v42 }
  0x90   : > { %726 = vrcp.f32 %v334_v35  ;;  %v384_v47 = vadd.f32 %v383_v45, %v382_v44 }
  0x99   : > { %v725_v48 = vpop.eup %724 }
  0x9a   : > { %v727_v49 = vpop.eup %726  ;;  %v393_v50 = vmul.f32 %v725_v48, %v391_v46  ;;  %v407_v51 = vmul.f32 %v725_v48, %v341_v34 }
  0x9b   : > { %v392_v52 = vmul.f32 %v727_v49, %v384_v47  ;;  %v406_v53 = vmul.f32 %v727_v49, %v334_v35 }
  0x9c   : > { %v395_v54 = vsel %vm289_vm0, %v393_v50, 0.0  ;;  %v409_v57 = vsel %vm289_vm0, %v407_v51, 0.0 }
  0x9d   : > { %v394_v55 = vsel %vm289_vm0, %v392_v52, 0.0  ;;  %v408_v56 = vsel %vm289_vm0, %v406_v53, 0.0 }
  0x9e   : > { %v396_v58 = vadd.f32 %v395_v54, %v394_v55  ;;  %v410_v59 = vadd.f32 %v409_v57, %v408_v56 }
  0xa0   : > { %397 = vadd.xlane.f32.xlu0 %v396_v58 }
  0xa4   : > { %411 = vadd.xlane.f32.xlu0 %v410_v59 }
 0x114   : > { %v436_v60 = vpop.xlane.xlu1 %435 }
 0x115   : > { %v437_v61 = vrot.slane %v436_v60, 4 }
 0x117   : > { %v438_v62 = vadd.f32 %v437_v61, %v436_v60 }
 0x119   : > { %v439_v2 = vrot.slane %v438_v62, 2 }
 0x11b   : > { %v440_v8 = vadd.f32 %v439_v2, %v438_v62 }
 0x11d   : > { %v441_v13 = vrot.slane %v440_v8, 1 }
 0x11f   : > { %v442_v16 = vadd.f32 %v441_v13, %v440_v8 }
 0x12d   : > { %v398_v63 = vpop.xlane.xlu0 %397 }
 0x12e   : > { %v399_v0 = vrot.slane %v398_v63, 4 }
 0x130   : > { %v400_v1 = vadd.f32 %v399_v0, %v398_v63 }
 0x131   : > { %v412_v3 = vpop.xlane.xlu0 %411 }
 0x132   : > { %v401_v4 = vrot.slane %v400_v1, 2  ;;  %v413_v5 = vrot.slane %v412_v3, 4 }
 0x134   : > { %v414_v6 = vadd.f32 %v413_v5, %v412_v3  ;;  %v402_v7 = vadd.f32 %v401_v4, %v400_v1 }
 0x136   : > { %v415_v9 = vrot.slane %v414_v6, 2  ;;  %v403_v10 = vrot.slane %v402_v7, 1 }
 0x138   : > { %v416_v11 = vadd.f32 %v415_v9, %v414_v6  ;;  %v404_v12 = vadd.f32 %v403_v10, %v402_v7 }
 0x13a   : > { %615 = vpush %v404_v12  ;;  %v417_v14 = vrot.slane %v416_v11, 1 }
 0x13c   : > { %v418_v15 = vadd.f32 %v417_v14, %v416_v11 }
 0x13e   : > { %617 = vpush %v418_v15 }
 0x13f   : > { %619 = vpush %v442_v16 }
 0x16b   : > { %s616_s8 = spop %615 }
 0x16c   : > { %s445_s6 = sadd.f32 %s616_s8, %s444_s11 }
 0x16d   : > { %457 = sbr.rel (!%p255_p11) target bundleno = 449 (0x1c1), region = 52 }
 0x16e   : > { %447 = sst [smem:[#allocation2]] %s445_s6 }
 0x16f   : > { %s618_s9 = spop %617  ;;  %s458_s25 = sld [smem:[#allocation2]] (%p255_p11) }
 0x170   : > { %s449_s19 = sadd.f32 %s618_s9, %s603_s12  ;;  %s620_s27 = spop %619 }
 0x171   : > { %s453_s23 = sadd.f32 %s620_s27, %s604_s7 }
 0x172   : > { %451 = sst [smem:[#allocation2 + $0x1]] %s449_s19 }
 0x173   : > { %455 = sst [smem:[#allocation2 + $0x2]] %s453_s23  ;;  %s605_s26 = sld [smem:[#allocation2 + $0x1]] (%p255_p11) }
 0x174   : > { %s606_s29 = sld [smem:[#allocation2 + $0x2]] }
 0x175   : > { %s459_s28 = smul.f32 2.0, %s458_s25 }
 0x177   : > { %s460_s20 = sadd.f32 1.0, %s459_s28 }
 0x17a   : > { %s463_s4 = sadd.f32 %s606_s29, %s605_s26 }
 0x17c   : > { %s464_s22 = sadd.f32 1.0, %s463_s4 }
 0x17e   : > { %v465_v17 = vstv %s464_s22 }
 0x17f   : > { %728 = vrcp.f32 %v465_v17 }
 0x189   : > { %v729_v18 = vpop.eup %728 }
 0x18a   : > { %621 = vpush %v729_v18 }
 0x1bb   : > { %s622_s5 = spop %621 }
 0x1bc   : > { %s468_s21 = smul.f32 %s622_s5, %s460_s20 }
 0x1be   : > { %s469_s10 = ssub.f32 1.0, %s468_s21 }
 0x1c0   : > { %471 = sst [smem:[#allocation10]] %s469_s10 }
 0x1c1 PF: > { %p652_p13 = scmp.eq.s32.totalorder %s578_s18, 1  ;;  %s803_s12 = scalar_lea.hbm %s1176_s3, 16 }
 0x1c2   : > { %p804_p1 = scmp.ne.s32.totalorder %s1176_s3, %s803_s12  ;;  %p809_p3 = scmp.lt.u32.totalorder %s803_s12, %s1176_s3 }
 0x1c4   : > { %p805_p2 = pnand %p804_p1, %p652_p13 }
 0x1c6   : > { %p806_p4 = pneg %p805_p2 }
 0x1c8   : > { %p811_p6 = pnand %p809_p3, %p806_p4 }
 0x1ca   : > { %814 = shalt.err (!%p811_p6)
}
 0x1cb   : > { %s886_s19 = smov [#allocation10]  }
 0x1cc   : > { %635 = dma.smem_to_hbm (%p652_p13), %s886_s19, 16, %s1176_s3, [#allocation6]  }
 0x1cd   : > { %852 = dma.done.wait (%p652_p13), [#allocation6], 16  }
 0x1ce   : > { %854 = vsyncadd (%p652_p13), [#allocation6], 4294967280 }
 0x1cf   : > { %485 = sfence }
 0x1d0 PF: > { %s21_s17 = sadd.s32 1, %s877_s17   ;;  %s1186_s12 = smov %s861_s13 }
 0x1d1   : > { %p18_p5 = scmp.ge.s32.totalorder %s21_s17, 4   ;;  %s1187_s13 = smov %s865_s14 }
 0x1d2   : > { %s1188_s14 = smov %s998_s30  ;;  %s1189_s15 = smov %s873_s16 }
 0x1d3   : > { %s1190_s16 = smov %s1192_s24  ;;  %20 = sbr.rel (!%p18_p5) target bundleno = 8 (0x8), region = 102 }
 0x1da   :  { %491 = vsyncpa [#allocation4], 1 }
 0x1db   :  { %493 = vsyncpa [#allocation4 + $0x1], 1 }
 0x1dc   :  { %494 = vsyncpa [#allocation9], 1 }
 0x1dd   :  { %496 = vsyncpa [#allocation9 + $0x1], 1 }
 0x1de   :  { %497 = vsyncpa [#allocation5], 1 }
 0x1df   :  { %499 = vsyncpa [#allocation5 + $0x1], 1 }
 0x1e0   :  { %500 = vsyncpa [#allocation6], 1 }
 0x1e1   :  { %502 = vsyncpa [#allocation6 + $0x1], 1 }

</bundles_post_ra>
